<compile_context>
chip_gen: v6e
topology: v6e:2x2x1
jax: 0.10.0
libtpu: 0.0.40
codegen_flags: <defaults>
</compile_context>

<pallas_src>
import functools

import jax
import jax.numpy as jnp
from jax.experimental import pallas as pl
from jax.experimental.pallas import tpu as pltpu


def _round_up(x, m):
    return ((x + m - 1) // m) * m


def _cdiv(a, b):
    return -(-a // b)


# ---------------------------------------------------------------------------
# Kernel body: whole MLP fused. Refs:
#   (x_ref [in0, TILE_B], w0 [o0,in0], b0 [o0,1], w1, b1, ..., out_ref [o_last, TILE_B])
# All activations live on [features, batch_tile] so every load / matmul /
# store is lane-dense (batch on the 128-lane axis).
# ---------------------------------------------------------------------------
def _mlp_kernel(*refs, num_layers, activation, compute_dtype):
    x_ref = refs[0]
    out_ref = refs[-1]
    param_refs = refs[1:-1]

    h = x_ref[...]                                     # [in0, TILE_B] (compute_dtype)
    for i in range(num_layers):
        w = param_refs[2 * i][...]                     # [out_i, in_i]  (compute_dtype)
        b = param_refs[2 * i + 1][...]                 # [out_i, 1]     (f32)
        # MXU matmul with f32 accumulation; f32 bias broadcast along lanes.
        acc = jnp.dot(w, h, preferred_element_type=jnp.float32) + b
        if i < num_layers - 1:
            # bf16 epilogue: halves the dominant [hidden, TILE_B] intermediate
            # and the VALU work on v6e/v7x (bf16-capable VALUs).
            a = acc.astype(compute_dtype)
            if activation == 'ReLU':
                h = jnp.maximum(a, 0)
            elif activation == 'LeakyReLU':
                h = jnp.where(a >= 0, a, 0.01 * a)
            elif activation == 'sigmoid':
                h = jax.nn.sigmoid(a)
            elif activation == 'identity':
                h = a
            else:
                raise ValueError(f"unknown activation: {activation}")
        else:
            out_ref[...] = acc.astype(out_ref.dtype)   # bf16 write (lane-dense)


# ---------------------------------------------------------------------------
# Generation-aware VMEM limit / batch-tile selection.
# ---------------------------------------------------------------------------
def _vmem_limit_bytes():
    cap = None
    try:
        info = pltpu.get_tpu_info()
        for name in ("vmem_capacity_bytes", "vmem_size_bytes", "vmem_bytes"):
            v = getattr(info, name, None)
            if isinstance(v, int) and v > 0:
                cap = v
                break
    except Exception:
        cap = None
    if cap is None:
        cap = 64 * 1024 * 1024            # conservative (v7x-class) fallback
    limit = (cap * 3) // 4                # leave headroom for Mosaic scratch
    return max(32 * 1024 * 1024, min(limit, 112 * 1024 * 1024))


def _pick_tiling(batch, in_dim, out_dim, max_width, vmem_limit, tile_b_cap=None):
    if tile_b_cap is None:
        # Rough bytes per batch column in VMEM:
        #   x block (bf16, 2x buffered) + out block (bf16, 2x buffered)
        #   + f32 acc / bf16 hidden intermediates + slack.
        per_col = 4 * in_dim + 4 * out_dim + 12 * max_width + 128
        budget = int(vmem_limit * 0.75)
        tile_b_cap = (budget // per_col) // 128 * 128
        tile_b_cap = max(512, min(131072, tile_b_cap))
    n_tiles = _cdiv(batch, tile_b_cap)
    # Feed both TensorCores on v7x for non-trivial batches.
    if n_tiles == 1 and batch >= 4096:
        n_tiles = 2
    # Size tiles from the tile count -> padding waste is < 128 columns/tile.
    tile_b = _round_up(max(1, _cdiv(batch, n_tiles)), 128)
    return tile_b, n_tiles


# ---------------------------------------------------------------------------
# Wrapper
# ---------------------------------------------------------------------------
def mlp_forward(x, weights, biases, activation='ReLU', *,
                tile_b_cap=None, compute_dtype=jnp.bfloat16,
                kernel_out_dtype=jnp.bfloat16, out_dtype=jnp.float32):
    """x: [batch, 8]; weights[i]: [out_i, in_i] (PyTorch layout); biases[i]: [out_i]."""
    num_layers = len(weights)
    batch = x.shape[0]
    in_dim = int(weights[0].shape[1])
    out_dim = int(weights[-1].shape[0])
    max_width = max(in_dim, max(int(w.shape[0]) for w in weights))

    vmem_limit = _vmem_limit_bytes()
    tile_b, grid_b = _pick_tiling(batch, in_dim, out_dim, max_width,
                                  vmem_limit, tile_b_cap)
    b_pad = tile_b * grid_b

    # Single fused pad + transpose + bf16 cast of x: [batch, 8] f32 -> [8, b_pad] bf16.
    x_t = jnp.zeros((in_dim, b_pad), compute_dtype).at[:, :batch].set(
        x.astype(compute_dtype).T)

    params = []
    param_specs = []
    for w, b in zip(weights, biases):
        params.append(w.astype(compute_dtype))                     # [out_i, in_i]
        params.append(b.astype(jnp.float32).reshape(-1, 1))        # [out_i, 1]
        # Constant block index -> weights/biases stay VMEM-resident across steps.
        param_specs.append(pl.BlockSpec(params[-2].shape, lambda i: (0, 0)))
        param_specs.append(pl.BlockSpec(params[-1].shape, lambda i: (0, 0)))

    # Advisory cost estimate for XLA scheduling around the custom call.
    flops = 2 * b_pad * sum(int(w.shape[0]) * int(w.shape[1]) for w in weights)
    transcendentals = 0
    if activation == 'sigmoid' and num_layers > 1:
        transcendentals = b_pad * sum(int(w.shape[0]) for w in weights[:-1])
    bytes_accessed = (int(x_t.size) * x_t.dtype.itemsize
                      + b_pad * out_dim * jnp.dtype(kernel_out_dtype).itemsize
                      + sum(int(p.size) * p.dtype.itemsize for p in params))

    kernel = functools.partial(_mlp_kernel, num_layers=num_layers,
                               activation=activation, compute_dtype=compute_dtype)

    out_t = pl.pallas_call(
        kernel,
        out_shape=jax.ShapeDtypeStruct((out_dim, b_pad), kernel_out_dtype),
        grid=(grid_b,),
        in_specs=[pl.BlockSpec((in_dim, tile_b), lambda i: (0, i))] + param_specs,
        out_specs=pl.BlockSpec((out_dim, tile_b), lambda i: (0, i)),
        compiler_params=pltpu.CompilerParams(
            dimension_semantics=("parallel",),          # shard batch tiles across TCs
            vmem_limit_bytes=int(vmem_limit),
        ),
        cost_estimate=pl.CostEstimate(flops=flops,
                                      transcendentals=transcendentals,
                                      bytes_accessed=bytes_accessed),
    )(x_t, *params)

    # Back to [batch, out_dim] (module semantics: f32 output), dropping padding.
    return out_t[:, :batch].T.astype(out_dtype)


# ---------------------------------------------------------------------------
# Deterministic parameter init (matches nn.Linear's U(-1/sqrt(fan_in), +..) rule)
# Weights stored PyTorch-style: [out_features, in_features].
# ---------------------------------------------------------------------------
def init_mlp_params(key, hidden_size, num_of_layers):
    if num_of_layers == 1:
        dims = [(8, 4)]
    elif num_of_layers == 2:
        dims = [(8, hidden_size), (hidden_size, 4)]
    else:
        dims = [(8, hidden_size)]
        dims += [(hidden_size, hidden_size)] * (num_of_layers - 2)
        dims += [(hidden_size, 4)]

    weights, biases = [], []
    for (fan_in, fan_out) in dims:
        key, kw, kb = jax.random.split(key, 3)
        bound = 1.0 / jnp.sqrt(float(fan_in))
        w = jax.random.uniform(kw, (fan_out, fan_in), jnp.float32, -bound, bound)
        b = jax.random.uniform(kb, (fan_out,), jnp.float32, -bound, bound)
        weights.append(w)
        biases.append(b)
    return weights, biases


def mlp_reference(x, weights, biases, activation='ReLU',
                  compute_dtype=jnp.float32):
    """Pure-JAX reference. compute_dtype mirrors the kernel's matmul operand dtype."""
    h = x.astype(compute_dtype)
    n = len(weights)
    for i in range(n):
        acc = jnp.dot(h.astype(compute_dtype), weights[i].T.astype(compute_dtype),
                      preferred_element_type=jnp.float32) + biases[i].astype(jnp.float32)
        if i < n - 1:
            if activation == 'ReLU':
                acc = jnp.maximum(acc, 0.0)
            elif activation == 'LeakyReLU':
                acc = jnp.where(acc >= 0.0, acc, 0.01 * acc)
            elif activation == 'sigmoid':
                acc = jax.nn.sigmoid(acc)
            h = acc.astype(compute_dtype)
        else:
            h = acc
    return h


if __name__ == "__main__":
    key = jax.random.PRNGKey(0)
    key, kx = jax.random.split(key)

    hidden_size = 32
    num_of_layers = 3
    activation = 'ReLU'
    batch = 8

    x = jax.random.normal(kx, (batch, 8), jnp.float32)
    weights, biases = init_mlp_params(key, hidden_size, num_of_layers)

    out = mlp_forward(x, weights, biases, activation)
    out = jax.block_until_ready(out)
    assert out.shape == (batch, 4), out.shape

    # Near-exact-path reference (bf16 operands, f32 accumulation).
    ref_bf16 = mlp_reference(x, weights, biases, activation,
                             compute_dtype=jnp.bfloat16)
    assert jnp.allclose(out, ref_bf16, atol=2e-2, rtol=2e-2), "mismatch vs bf16 reference"

    # Full-f32 reference — loose check bounding the bf16 quantization error.
    ref_f32 = mlp_reference(x, weights, biases, activation,
                            compute_dtype=jnp.float32)
    assert jnp.allclose(out, ref_f32, atol=5e-2, rtol=5e-2), "mismatch vs f32 reference"

    print("KERNEL_OK")
</pallas_src>

<mosaic_0001>
module attributes {stable_mosaic.version = 11 : i64} {
  func.func @_mlp_kernel(%arg0: i32, %arg1: memref<8x128xbf16, #tpu.memory_space<vmem>>, %arg2: memref<32x8xbf16, #tpu.memory_space<vmem>>, %arg3: memref<32x1xf32, #tpu.memory_space<vmem>>, %arg4: memref<32x32xbf16, #tpu.memory_space<vmem>>, %arg5: memref<32x1xf32, #tpu.memory_space<vmem>>, %arg6: memref<4x32xbf16, #tpu.memory_space<vmem>>, %arg7: memref<4x1xf32, #tpu.memory_space<vmem>>, %arg8: memref<4x128xbf16, #tpu.memory_space<vmem>>) attributes {dimension_semantics = [#tpu.dimension_semantics<parallel>], iteration_bounds = array<i64: 1>, scalar_prefetch = 0 : i64, scratch_operands = 0 : i64, tpu.core_type = #tpu.core_type<tc>, window_params = [{transform_indices = @transform_0, window_bounds = array<i64: 8, 128>}, {pipeline_mode = #tpu.pipeline_mode<synchronous>, transform_indices = @transform_1, window_bounds = array<i64: 32, 8>}, {pipeline_mode = #tpu.pipeline_mode<synchronous>, transform_indices = @transform_2, window_bounds = array<i64: 32, 1>}, {pipeline_mode = #tpu.pipeline_mode<synchronous>, transform_indices = @transform_3, window_bounds = array<i64: 32, 32>}, {pipeline_mode = #tpu.pipeline_mode<synchronous>, transform_indices = @transform_4, window_bounds = array<i64: 32, 1>}, {pipeline_mode = #tpu.pipeline_mode<synchronous>, transform_indices = @transform_5, window_bounds = array<i64: 4, 32>}, {pipeline_mode = #tpu.pipeline_mode<synchronous>, transform_indices = @transform_6, window_bounds = array<i64: 4, 1>}, {transform_indices = @transform_7, window_bounds = array<i64: 4, 128>}]} {
    %c0 = arith.constant 0 : index
    %c0_0 = arith.constant 0 : index
    %0 = vector.load %arg1[%c0, %c0_0] : memref<8x128xbf16, #tpu.memory_space<vmem>>, vector<8x128xbf16>
    %c0_1 = arith.constant 0 : index
    %c0_2 = arith.constant 0 : index
    %1 = vector.load %arg2[%c0_1, %c0_2] : memref<32x8xbf16, #tpu.memory_space<vmem>>, vector<32x8xbf16>
    %c0_3 = arith.constant 0 : index
    %c0_4 = arith.constant 0 : index
    %2 = vector.load %arg3[%c0_3, %c0_4] : memref<32x1xf32, #tpu.memory_space<vmem>>, vector<32x1xf32>
    %cst = arith.constant dense<0.000000e+00> : vector<32x128xf32>
    %3 = tpu.matmul %1, %0, %cst {dimension_numbers = #tpu.dot_dimension_numbers<[1], [0], [0], [1], [0, 0, 1, 1], [], []>} : vector<32x8xbf16>, vector<8x128xbf16>, vector<32x128xf32> -> vector<32x128xf32>
    %4 = vector.broadcast %2 : vector<32x1xf32> to vector<32x128xf32>
    %5 = arith.addf %3, %4 : vector<32x128xf32>
    %6 = arith.truncf %5 : vector<32x128xf32> to vector<32x128xbf16>
    %cst_5 = arith.constant 0.000000e+00 : bf16
    %7 = vector.broadcast %cst_5 : bf16 to vector<32x128xbf16>
    %8 = arith.maximumf %6, %7 : vector<32x128xbf16>
    %c0_6 = arith.constant 0 : index
    %c0_7 = arith.constant 0 : index
    %9 = vector.load %arg4[%c0_6, %c0_7] : memref<32x32xbf16, #tpu.memory_space<vmem>>, vector<32x32xbf16>
    %c0_8 = arith.constant 0 : index
    %c0_9 = arith.constant 0 : index
    %10 = vector.load %arg5[%c0_8, %c0_9] : memref<32x1xf32, #tpu.memory_space<vmem>>, vector<32x1xf32>
    %cst_10 = arith.constant dense<0.000000e+00> : vector<32x128xf32>
    %11 = tpu.matmul %9, %8, %cst_10 {dimension_numbers = #tpu.dot_dimension_numbers<[1], [0], [0], [1], [0, 0, 1, 1], [], []>} : vector<32x32xbf16>, vector<32x128xbf16>, vector<32x128xf32> -> vector<32x128xf32>
    %12 = vector.broadcast %10 : vector<32x1xf32> to vector<32x128xf32>
    %13 = arith.addf %11, %12 : vector<32x128xf32>
    %14 = arith.truncf %13 : vector<32x128xf32> to vector<32x128xbf16>
    %cst_11 = arith.constant 0.000000e+00 : bf16
    %15 = vector.broadcast %cst_11 : bf16 to vector<32x128xbf16>
    %16 = arith.maximumf %14, %15 : vector<32x128xbf16>
    %c0_12 = arith.constant 0 : index
    %c0_13 = arith.constant 0 : index
    %17 = vector.load %arg6[%c0_12, %c0_13] : memref<4x32xbf16, #tpu.memory_space<vmem>>, vector<4x32xbf16>
    %c0_14 = arith.constant 0 : index
    %c0_15 = arith.constant 0 : index
    %18 = vector.load %arg7[%c0_14, %c0_15] : memref<4x1xf32, #tpu.memory_space<vmem>>, vector<4x1xf32>
    %cst_16 = arith.constant dense<0.000000e+00> : vector<4x128xf32>
    %19 = tpu.matmul %17, %16, %cst_16 {dimension_numbers = #tpu.dot_dimension_numbers<[1], [0], [0], [1], [0, 0, 1, 1], [], []>} : vector<4x32xbf16>, vector<32x128xbf16>, vector<4x128xf32> -> vector<4x128xf32>
    %20 = vector.broadcast %18 : vector<4x1xf32> to vector<4x128xf32>
    %21 = arith.addf %19, %20 : vector<4x128xf32>
    %22 = arith.truncf %21 : vector<4x128xf32> to vector<4x128xbf16>
    %c0_17 = arith.constant 0 : index
    %c0_18 = arith.constant 0 : index
    %23 = vector.load %arg8[%c0_17, %c0_18] : memref<4x128xbf16, #tpu.memory_space<vmem>>, vector<4x128xbf16>
    tpu.vector_store %arg8[%c0_17, %c0_18], %22 {strides = array<i32>} : memref<4x128xbf16, #tpu.memory_space<vmem>>, vector<4x128xbf16>,
    return
  }
  func.func @transform_0(%arg0: i32) -> (i32, i32) {
    %c0_i32 = arith.constant 0 : i32
    %c0_i32_0 = arith.constant 0 : i32
    return %c0_i32, %arg0 : i32, i32
  }
  func.func @transform_1(%arg0: i32) -> (i32, i32) {
    %c0_i32 = arith.constant 0 : i32
    %c0_i32_0 = arith.constant 0 : i32
    %c0_i32_1 = arith.constant 0 : i32
    return %c0_i32, %c0_i32_0 : i32, i32
  }
  func.func @transform_2(%arg0: i32) -> (i32, i32) {
    %c0_i32 = arith.constant 0 : i32
    %c0_i32_0 = arith.constant 0 : i32
    %c0_i32_1 = arith.constant 0 : i32
    return %c0_i32, %c0_i32_0 : i32, i32
  }
  func.func @transform_3(%arg0: i32) -> (i32, i32) {
    %c0_i32 = arith.constant 0 : i32
    %c0_i32_0 = arith.constant 0 : i32
    %c0_i32_1 = arith.constant 0 : i32
    return %c0_i32, %c0_i32_0 : i32, i32
  }
  func.func @transform_4(%arg0: i32) -> (i32, i32) {
    %c0_i32 = arith.constant 0 : i32
    %c0_i32_0 = arith.constant 0 : i32
    %c0_i32_1 = arith.constant 0 : i32
    return %c0_i32, %c0_i32_0 : i32, i32
  }
  func.func @transform_5(%arg0: i32) -> (i32, i32) {
    %c0_i32 = arith.constant 0 : i32
    %c0_i32_0 = arith.constant 0 : i32
    %c0_i32_1 = arith.constant 0 : i32
    return %c0_i32, %c0_i32_0 : i32, i32
  }
  func.func @transform_6(%arg0: i32) -> (i32, i32) {
    %c0_i32 = arith.constant 0 : i32
    %c0_i32_0 = arith.constant 0 : i32
    %c0_i32_1 = arith.constant 0 : i32
    return %c0_i32, %c0_i32_0 : i32, i32
  }
  func.func @transform_7(%arg0: i32) -> (i32, i32) {
    %c0_i32 = arith.constant 0 : i32
    %c0_i32_0 = arith.constant 0 : i32
    return %c0_i32, %arg0 : i32, i32
  }
}

</mosaic_0001>

<bundles_post_ra>
// kernel: tpu_custom_call.1
= control target key start
LH: loop header
LB: loop body
LE: loop exit
PB: predicated region body
PF: predicated region fallthrough
CT: control target
= control target key end

     0   :  { %vm74_vm0 = vcmask 1043456   ;;  %vm67_vm1 = vcmask 64512   ;;  %v369_v5 = vmov 0   ;;  %s470_s0 = inlined_call_operand.vmem [shape: bf16[8,128], index: 0, kind: input, shape index: {}]   ;;  %s471_s1 = inlined_call_operand.vmem [shape: bf16[32,8], index: 1, kind: input, shape index: {}]   ;;  %s472_s2 = inlined_call_operand.vmem [shape: f32[32,1], index: 2, kind: input, shape index: {}]   ;;  %s473_s3 = inlined_call_operand.vmem [shape: bf16[32,32], index: 3, kind: input, shape index: {}]   ;;  %s474_s4 = inlined_call_operand.vmem [shape: f32[32,1], index: 4, kind: input, shape index: {}]   ;;  %s475_s5 = inlined_call_operand.vmem [shape: bf16[4,32], index: 5, kind: input, shape index: {}]   ;;  %s476_s6 = inlined_call_operand.vmem [shape: f32[4,1], index: 6, kind: input, shape index: {}]   ;;  %s477_s7 = inlined_call_operand.hbm [shape: bf16[4,128], index: 7, kind: output, shape index: {}]  }
   0x1   :  { %v28_v0 = vld [vmem:[%s470_s0] sm:$0xf]  ;;  %v344_v3 = vld [vmem:[%s471_s1 + $0x8] sm:$0xff]   ;;  %v35_v4 = vld [vmem:[%s472_s2 + $0x10] sm:$0xff]  ;;  %341 = vset.pattern.permute.xlu0 %v369_v5  ;;  %342 = vset.pattern.permute.xlu1 %v369_v5 }
   0x2   :  { %v343_v1 = vld [vmem:[%s471_s1] sm:$0xff]   ;;  %336 = vmatprep.subr.msk.bf16.mxu0 %vm74_vm0, %v28_v0  ;;  %v76_v2 = vsel %vm74_vm0, %v28_v0, 0  ;;  %49 = vperm.xlu0 %341, %v35_v4   ;;  %v36_v7 = vld [vmem:[%s472_s2 + $0x18] sm:$0xff]  ;;  %v34_v8 = vld [vmem:[%s472_s2 + $0x8] sm:$0xff] }
   0x3   :  { %315 = vmatpush3.bf16.msra.mxu0 %v76_v2  ;;  %316 = vmatprep.mubr.msk.bf16.mxu0 %vm67_vm1, %v343_v1  ;;  %v33_v6 = vld [vmem:[%s472_s2] sm:$0xff] }
   0x4   :  { %39 = vperm.xlu1 %342, %v33_v6  }
   0x6   :  { %317 = vmatmul.mubr.msk.bf16.vlgmr.msra.gmra.mxu0 %vm67_vm1, %v344_v3 }
   0x7   :  { %12 = vsyncpa [#allocation3], 0  ;;  %54 = vperm.xlu0 %341, %v36_v7   ;;  %v137_v9 = vld [vmem:[%s474_s4 + $0x10] sm:$0xff]  ;;  %v138_v10 = vld [vmem:[%s474_s4 + $0x18] sm:$0xff]  ;;  %vm169_vm2 = vcmask 261120   ;;  %v370_v32 = vmov 0.0  }
   0x8   :  { %44 = vperm.xlu1 %342, %v34_v8   ;;  %v135_v11 = vld [vmem:[%s474_s4] sm:$0xff]  ;;  %v136_v12 = vld [vmem:[%s474_s4 + $0x8] sm:$0xff]  ;;  %328 = vmatprep.subr.bf16.mxu0 %v370_v32  ;;  %vm371_vm3 = vmmov 0   ;;  %s372_s25 = smov [#allocation2]  }
   0x9   :  { %v230_v13 = vld [vmem:[%s476_s6] sm:$0xf]  ;;  %v346_v31 = vld [vmem:[%s473_s3 + $0x8] sm:$0xff]   ;;  %332 = vmatprep.mubr.msk.bf16.mxu0 %vm371_vm3, %v370_v32  ;;  %s287_s26 = sshll.u32 %s372_s25, 4  ;;  %s288_s26 = int_to_ptr.vmem [resolvable:$true] %s287_s26 }
   0xa   :  { %v345_v14 = vld [vmem:[%s473_s3] sm:$0xff]   ;;  %s347_s27 = scalar_lea.vmem %s288_s26, 32  ;;  %p352_p1 = scmp.lt.s32.totalorder %s288_s26, %s288_s26 }
   0xb   :  { %151 = vperm.xlu0 %341, %v137_v9   ;;  %324 = vmatprep.mubr.msk.bf16.mxu1 %vm169_vm2, %v345_v14  ;;  %v229_v49 = vld [vmem:[%s475_s5] sm:$0x3]  ;;  %p348_p0 = scmp.ne.s32.totalorder %s288_s26, %s347_s27  ;;  %p353_p2 = scmp.lt.s32.totalorder %s347_s27, %s347_s27 }
   0xc   :  { %156 = vperm.xlu1 %342, %v138_v10  }
   0xd   :  { %p354_p3 = por %p353_p2, %p352_p1 }
   0xf   :  { %141 = vperm.xlu0 %341, %v135_v11   ;;  %p355_p4 = pnand %p354_p3, %p348_p0 }
  0x10   :  { %146 = vperm.xlu1 %342, %v136_v12  }
  0x13   :  { %233 = vperm.xlu0 %341, %v230_v13  }
  0x7d   :  { %v50_v15 = vpop.permute.xlu0 %49 }
  0x7f   :  { %v40_v16 = vpop.permute.xlu1 %39 }
  0x82   :  { %v55_v19 = vpop.permute.xlu0 %54 }
  0x83   :  { %v45_v23 = vpop.permute.xlu1 %44 }
  0x86   :  { %v152_v33 = vpop.permute.xlu0 %151 }
  0x87   :  { %v157_v34 = vpop.permute.xlu1 %156 }
  0x8a   :  { %v142_v38 = vpop.permute.xlu0 %141 }
  0x8b   :  { %v147_v41 = vpop.permute.xlu1 %146 }
  0x8e   :  { %v234_v50 = vpop.permute.xlu0 %233 }
  0xc6   :  { %v318_v17 = vpop.f32.mrf.mxu0 }
  0xc7   :  { %v121_v21 = vadd.f32 %v318_v17, %v50_v15 }
  0xc8   :  { %v112_v18 = vpop.f32.mrf.mxu0 }
  0xc9   :  { %v113_v25 = vadd.f32 %v112_v18, %v40_v16 }
  0xca   :  { %v319_v20 = vpop.f32.mrf.mxu0 }
  0xcb   :  { %v124_v22 = vadd.f32 %v319_v20, %v55_v19 }
  0xcc   :  { %v115_v24 = vpop.f32.mrf.mxu0 }
  0xcd   :  { %v128_v26 = vpack.c.bf16 %v124_v22, %v121_v21  ;;  %v116_v27 = vadd.f32 %v115_v24, %v45_v23 }
  0xcf   :  { %v127_v28 = vpack.c.bf16 %v116_v27, %v113_v25  ;;  %v130_v29 = vmax.bf16 %v369_v5, %v128_v26 }
  0xd1   :  { %320 = vmatprep.subr.bf16.mxu1 %v130_v29  ;;  %v129_v30 = vmax.bf16 %v369_v5, %v127_v28 }
  0xd2   :  { %321 = vmatpush3.bf16.msra.mxu1 %v130_v29 }
  0xd3   :  { %322 = vmatprep.subr.bf16.mxu1 %v129_v30 }
  0xd6   :  { %323 = vmatpush3.bf16.msra.mxu1 %v129_v30 }
  0xd9   :  { %325 = vmatmul.mubr.msk.bf16.vlgmr.msra.gmra.mxu1 %vm169_vm2, %v346_v31 }
 0x199   :  { %v326_v35 = vpop.f32.mrf.mxu1 }
 0x19a   :  { %v219_v39 = vadd.f32 %v326_v35, %v152_v33 }
 0x19b   :  { %v210_v36 = vpop.f32.mrf.mxu1 }
 0x19c   :  { %v211_v43 = vadd.f32 %v210_v36, %v142_v38 }
 0x19d   :  { %v327_v37 = vpop.f32.mrf.mxu1 }
 0x19e   :  { %v222_v40 = vadd.f32 %v327_v37, %v157_v34 }
 0x19f   :  { %v213_v42 = vpop.f32.mrf.mxu1 }
 0x1a0   :  { %v226_v44 = vpack.c.bf16 %v222_v40, %v219_v39  ;;  %v214_v45 = vadd.f32 %v213_v42, %v147_v41 }
 0x1a2   :  { %v228_v46 = vmax.bf16 %v369_v5, %v226_v44  ;;  %v225_v47 = vpack.c.bf16 %v214_v45, %v211_v43 }
 0x1a4   :  { %329 = vmatpush3.bf16.msra.mxu0 %v228_v46  ;;  %v227_v48 = vmax.bf16 %v369_v5, %v225_v47 }
 0x1a5   :  { %330 = vmatprep.subr.bf16.mxu0 %v370_v32 }
 0x1a8   :  { %331 = vmatpush3.bf16.msra.mxu0 %v227_v48 }
 0x1ab   :  { %333 = vmatmul.mubr.msk.bf16.vlgmr.msra.gmra.mxu0 %vm169_vm2, %v229_v49 }
 0x26b   :  { %v273_v51 = vpop.f32.mrf.mxu0 }
 0x26c   :  { %v274_v52 = vadd.f32 %v273_v51, %v234_v50 }
 0x26d   :  { %v334_v53 = vpop.f32.mrf.mxu0 }
 0x26e   :  { %v279_v54 = vpack.c.bf16 %v274_v52, %v274_v52 }
 0x26f   :  { %v276_v55 = vpop.f32.mrf.mxu0 }
 0x270   :  { %280 = vst [vmem:[#allocation2] sm:$0x3] %v279_v54 }
 0x271   :  { %v335_v56 = vpop.f32.mrf.mxu0 }
 0x272   :  { %358 = shalt.err (!%p355_p4)
}
 0x273   :  { %290 = dma.vmem_to_hbm [thread:$0]  %s288_s26, 32, %s477_s7, [#allocation3]  }
 0x274   :  { %367 = dma.done.wait [#allocation3], 32  }
 0x275   :  { %368 = vsyncadd [#allocation3], 4294967264 }
 0x276   :  { %294 = vsyncpa [#allocation3], 1 }

</bundles_post_ra>
